<compile_context>
chip_gen: v6e
topology: v6e:2x2x1
jax: 0.10.0
libtpu: 0.0.40
codegen_flags: <defaults>
</compile_context>

<pallas_src>
import numpy as np
import jax
import jax.numpy as jnp
from jax.experimental import pallas as pl
from jax.experimental.pallas import tpu as pltpu


# ----------------------------------------------------------------------------
# Kernel: one batch tile, batch on the lane (last) axis.
#   params = MLP(condition)  (Linear->ReLU->Linear->ReLU->Linear), transposed:
#     h1 = relu(W1ᵀ @ cond + b1)   (32, TB)
#     h2 = relu(W2ᵀ @ h1   + b2)   (16, TB)
#     p  =       W3ᵀ @ h2  + b3    ( 2, TB)
#   s = p[0], t = p[1]
#   out[0] = z = (a - t) * exp(-s);  out[1] = log_det = -s
# ----------------------------------------------------------------------------
def _cond_affine_kernel(a_ref, cond_ref, w1_ref, b1_ref, w2_ref, b2_ref,
                        w3_ref, b3_ref, out_ref):
    mm_dtype = cond_ref.dtype
    cond = cond_ref[...]                                  # (D,  TB) compute dtype
    a = a_ref[...]                                        # (1,  TB) f32

    h1 = jnp.dot(w1_ref[...], cond, preferred_element_type=jnp.float32)
    h1 = jnp.maximum(h1 + b1_ref[...], 0.0).astype(mm_dtype)   # (32, TB), cast folded

    h2 = jnp.dot(w2_ref[...], h1, preferred_element_type=jnp.float32)
    h2 = jnp.maximum(h2 + b2_ref[...], 0.0).astype(mm_dtype)   # (16, TB), cast folded

    p = jnp.dot(w3_ref[...], h2, preferred_element_type=jnp.float32)
    p = p + b3_ref[...]                                   # (2, TB) f32

    neg_s = -p[0:1, :]                                    # (1, TB)
    t = p[1:2, :]                                         # (1, TB)
    z = (a - t) * jnp.exp(neg_s)                          # one EUP exp, no div, no log

    out_ref[...] = jnp.concatenate([z, neg_s], axis=0)    # fused (2, TB) output


# ----------------------------------------------------------------------------
# Tiling / VMEM sizing helpers.
# ----------------------------------------------------------------------------
def _vmem_capacity_bytes():
    try:
        return int(pltpu.get_tpu_info().vmem_capacity_bytes)
    except Exception:
        return 64 * 1024 * 1024      # conservative: v7x per-TensorCore VMEM


def _choose_batch_tile(B, D, compute_dtype, block_b, vmem_budget):
    """Pick (tile_b, n_blocks) for the 1-D batch grid."""
    if B <= 1024:
        # Small batch: single (possibly lane-sparse) block, no padding games.
        return B, 1

    itemsize = int(np.dtype(compute_dtype).itemsize)
    # Per-batch-element VMEM bytes: double-buffered inputs/outputs + kernel
    # intermediates (h1/h2/p in f32 plus their compute-dtype copies).
    cast_extra = 0 if itemsize >= 4 else (32 + 16) * itemsize
    per_elem = (2 * D * itemsize        # condition block, double-buffered
                + 2 * 4                 # a block, double-buffered f32
                + 2 * 2 * 4             # fused (2, tb) output, double-buffered f32
                + (32 + 16 + 2) * 4     # h1/h2/p f32 intermediates
                + cast_extra)           # compute-dtype copies of h1/h2
    max_tb = max(512, (vmem_budget // per_elem) // 512 * 512)
    tb = max(512, (min(block_b, max_tb) // 512) * 512)

    # Keep >= 2 blocks so the "parallel" batch axis can split across the two
    # v7x TensorCores; costs only one extra ~0.35us grid step on 1-TC chips.
    n_blocks = max(2, pl.cdiv(B, tb))
    quantum = 512 if B >= 4096 else 128
    tb = pl.cdiv(pl.cdiv(B, n_blocks), quantum) * quantum   # rebalance -> less padding
    n_blocks = max(2, pl.cdiv(B, tb))
    return tb, n_blocks


# ----------------------------------------------------------------------------
# Wrapper.
# ----------------------------------------------------------------------------
def conditional_affine_forward(a, condition, params, *, block_b=65536,
                               compute_dtype=jnp.bfloat16,
                               condition_transposed=False):
    """Forward pass of ConditionalAffineLayer.

    a: (B, 1) f32.  condition: (B, D)  (or (D, B) if condition_transposed=True).
    Returns (z (B, 1) f32, log_det (B,) f32).
    """
    w1, b1, w2, b2, w3, b3 = params
    B = a.shape[0]
    H1, H2 = w1.shape[1], w2.shape[1]

    # Lane-dense layout: batch on the lane (last) axis, weights transposed so
    # the kernel computes Wᵀ @ x.  Transpose+cast done in one expression so XLA
    # fuses it into a single HBM copy; pass condition already as (D, B) to skip it.
    if condition_transposed:
        D = condition.shape[0]
        cond_t = condition.astype(compute_dtype)                  # (D, B)
    else:
        D = condition.shape[1]
        cond_t = jnp.transpose(condition).astype(compute_dtype)   # (D, B)
    a_t = jnp.transpose(a).astype(jnp.float32)                    # (1, B)
    w1t = jnp.transpose(w1).astype(compute_dtype)                 # (32, D)
    w2t = jnp.transpose(w2).astype(compute_dtype)                 # (16, 32)
    w3t = jnp.transpose(w3).astype(compute_dtype)                 # (2, 16)
    b1c = b1.reshape(H1, 1).astype(jnp.float32)
    b2c = b2.reshape(H2, 1).astype(jnp.float32)
    b3c = b3.reshape(2, 1).astype(jnp.float32)

    # Generation-aware tile sizing: large tiles amortize ~0.35us/step grid
    # overhead, capped by a per-chip VMEM budget (v7x: 64 MiB physical).
    vmem_cap = _vmem_capacity_bytes()
    vmem_budget = min(vmem_cap // 2, 40 * 1024 * 1024)
    tb, n_blocks = _choose_batch_tile(B, D, compute_dtype, block_b, vmem_budget)
    Bp = tb * n_blocks
    if Bp != B:
        a_t = jnp.pad(a_t, ((0, 0), (0, Bp - B)))
        cond_t = jnp.pad(cond_t, ((0, 0), (0, Bp - B)))

    batch_spec = lambda rows: pl.BlockSpec((rows, tb), lambda i: (0, i))
    resident = lambda shape: pl.BlockSpec(shape, lambda i: (0, 0))

    out = pl.pallas_call(
        _cond_affine_kernel,
        out_shape=jax.ShapeDtypeStruct((2, Bp), jnp.float32),
        grid=(n_blocks,),
        in_specs=[
            batch_spec(1),                         # a          (1, tb)
            batch_spec(D),                         # condition  (D, tb)
            resident((H1, D)), resident((H1, 1)),  # W1ᵀ, b1 (VMEM-resident)
            resident((H2, H1)), resident((H2, 1)), # W2ᵀ, b2
            resident((2, H2)), resident((2, 1)),   # W3ᵀ, b3
        ],
        out_specs=batch_spec(2),                   # fused [z; -s]  (2, tb)
        compiler_params=pltpu.CompilerParams(
            dimension_semantics=("parallel",),     # megacore split on v7x
            vmem_limit_bytes=48 * 1024 * 1024),    # explicit, <= v7x 64 MiB physical
    )(a_t, cond_t, w1t, b1c, w2t, b2c, w3t, b3c)

    z = jnp.transpose(out[0:1, :B])                # (B, 1)
    log_det = out[1, :B]                           # (B,)  (matches torch .squeeze(1))
    return z, log_det


# ----------------------------------------------------------------------------
# Deterministic parameter init (shapes from nn.Sequential in __init__):
#   Linear(cond_dim, 32) -> Linear(32, 16) -> Linear(16, 2), stored (in, out).
# ----------------------------------------------------------------------------
def init_params(key, condition_dim):
    ks = jax.random.split(key, 6)

    def uinit(k, shape, fan_in):
        bound = 1.0 / jnp.sqrt(fan_in)
        return jax.random.uniform(k, shape, jnp.float32, -bound, bound)

    w1 = uinit(ks[0], (condition_dim, 32), condition_dim)
    b1 = uinit(ks[1], (32,), condition_dim)
    w2 = uinit(ks[2], (32, 16), 32)
    b2 = uinit(ks[3], (16,), 32)
    w3 = uinit(ks[4], (16, 2), 16)
    b3 = uinit(ks[5], (2,), 16)
    return (w1, b1, w2, b2, w3, b3)


def reference_forward(a, condition, params):
    """Pure-JAX reference with the original torch-style tail."""
    w1, b1, w2, b2, w3, b3 = params
    h1 = jnp.maximum(condition @ w1 + b1, 0.0)
    h2 = jnp.maximum(h1 @ w2 + b2, 0.0)
    p = h2 @ w3 + b3
    s, t = p[:, 0:1], p[:, 1:2]
    scale = jnp.exp(s)
    z = (a - t) / scale
    log_det = -jnp.log(scale).squeeze(1)
    return z, log_det


# TODO(synk): inverse() not required for the forward pass; not implemented here.

if __name__ == "__main__":
    key = jax.random.PRNGKey(0)
    k_a, k_c, k_p, k_a2, k_c2 = jax.random.split(key, 5)

    # --- small test at module-scale shapes: batch=8, condition_dim=4 ----------
    B, D = 8, 4
    a = jax.random.normal(k_a, (B, 1), jnp.float32)
    condition = jax.random.normal(k_c, (B, D), jnp.float32)
    params = init_params(k_p, D)
    z_ref, ld_ref = reference_forward(a, condition, params)

    # f32 MXU path: tight tolerance.
    z, log_det = conditional_affine_forward(a, condition, params,
                                            compute_dtype=jnp.float32)
    jax.block_until_ready((z, log_det))
    assert z.shape == (B, 1) and log_det.shape == (B,)
    assert jnp.allclose(z, z_ref, atol=1e-5, rtol=1e-5)
    assert jnp.allclose(log_det, ld_ref, atol=1e-5, rtol=1e-5)

    # Default bf16 MXU path (f32 accumulation + f32 tail): looser tolerance.
    zb, ldb = conditional_affine_forward(a, condition, params)
    jax.block_until_ready((zb, ldb))
    assert jnp.allclose(zb, z_ref, atol=5e-2, rtol=5e-2)
    assert jnp.allclose(ldb, ld_ref, atol=5e-2, rtol=5e-2)

    # --- larger batch exercising the multi-block grid + padding path ----------
    B2, D2 = 2000, 4
    a2 = jax.random.normal(k_a2, (B2, 1), jnp.float32)
    cond2 = jax.random.normal(k_c2, (B2, D2), jnp.float32)
    params2 = init_params(jax.random.PRNGKey(1), D2)
    z2_ref, ld2_ref = reference_forward(a2, cond2, params2)

    z2, ld2 = conditional_affine_forward(a2, cond2, params2,
                                         compute_dtype=jnp.float32)
    jax.block_until_ready((z2, ld2))
    assert z2.shape == (B2, 1) and ld2.shape == (B2,)
    assert jnp.allclose(z2, z2_ref, atol=1e-5, rtol=1e-5)
    assert jnp.allclose(ld2, ld2_ref, atol=1e-5, rtol=1e-5)

    z3, ld3 = conditional_affine_forward(a2, cond2, params2)   # default bf16
    jax.block_until_ready((z3, ld3))
    assert jnp.allclose(z3, z2_ref, atol=5e-2, rtol=5e-2)
    assert jnp.allclose(ld3, ld2_ref, atol=5e-2, rtol=5e-2)

    print("KERNEL_OK")
</pallas_src>

<mosaic_0001>
module attributes {stable_mosaic.version = 11 : i64} {
  func.func @_cond_affine_kernel(%arg0: i32, %arg1: memref<1x8xf32, #tpu.memory_space<vmem>>, %arg2: memref<4x8xf32, #tpu.memory_space<vmem>>, %arg3: memref<32x4xf32, #tpu.memory_space<vmem>>, %arg4: memref<32x1xf32, #tpu.memory_space<vmem>>, %arg5: memref<16x32xf32, #tpu.memory_space<vmem>>, %arg6: memref<16x1xf32, #tpu.memory_space<vmem>>, %arg7: memref<2x16xf32, #tpu.memory_space<vmem>>, %arg8: memref<2x1xf32, #tpu.memory_space<vmem>>, %arg9: memref<2x8xf32, #tpu.memory_space<vmem>>) attributes {dimension_semantics = [#tpu.dimension_semantics<parallel>], iteration_bounds = array<i64: 1>, scalar_prefetch = 0 : i64, scratch_operands = 0 : i64, tpu.core_type = #tpu.core_type<tc>, window_params = [{transform_indices = @transform_0, window_bounds = array<i64: 1, 8>}, {transform_indices = @transform_1, window_bounds = array<i64: 4, 8>}, {pipeline_mode = #tpu.pipeline_mode<synchronous>, transform_indices = @transform_2, window_bounds = array<i64: 32, 4>}, {pipeline_mode = #tpu.pipeline_mode<synchronous>, transform_indices = @transform_3, window_bounds = array<i64: 32, 1>}, {pipeline_mode = #tpu.pipeline_mode<synchronous>, transform_indices = @transform_4, window_bounds = array<i64: 16, 32>}, {pipeline_mode = #tpu.pipeline_mode<synchronous>, transform_indices = @transform_5, window_bounds = array<i64: 16, 1>}, {pipeline_mode = #tpu.pipeline_mode<synchronous>, transform_indices = @transform_6, window_bounds = array<i64: 2, 16>}, {pipeline_mode = #tpu.pipeline_mode<synchronous>, transform_indices = @transform_7, window_bounds = array<i64: 2, 1>}, {transform_indices = @transform_8, window_bounds = array<i64: 2, 8>}]} {
    %c0 = arith.constant 0 : index
    %c0_0 = arith.constant 0 : index
    %0 = vector.load %arg2[%c0, %c0_0] : memref<4x8xf32, #tpu.memory_space<vmem>>, vector<4x8xf32>
    %c0_1 = arith.constant 0 : index
    %c0_2 = arith.constant 0 : index
    %1 = vector.load %arg1[%c0_1, %c0_2] : memref<1x8xf32, #tpu.memory_space<vmem>>, vector<1x8xf32>
    %c0_3 = arith.constant 0 : index
    %c0_4 = arith.constant 0 : index
    %2 = vector.load %arg3[%c0_3, %c0_4] : memref<32x4xf32, #tpu.memory_space<vmem>>, vector<32x4xf32>
    %cst = arith.constant dense<0.000000e+00> : vector<32x8xf32>
    %3 = tpu.matmul %2, %0, %cst {dimension_numbers = #tpu.dot_dimension_numbers<[1], [0], [0], [1], [0, 0, 1, 1], [], []>} : vector<32x4xf32>, vector<4x8xf32>, vector<32x8xf32> -> vector<32x8xf32>
    %c0_5 = arith.constant 0 : index
    %c0_6 = arith.constant 0 : index
    %4 = vector.load %arg4[%c0_5, %c0_6] : memref<32x1xf32, #tpu.memory_space<vmem>>, vector<32x1xf32>
    %5 = vector.broadcast %4 : vector<32x1xf32> to vector<32x8xf32>
    %6 = arith.addf %3, %5 : vector<32x8xf32>
    %cst_7 = arith.constant 0.000000e+00 : f32
    %7 = vector.broadcast %cst_7 : f32 to vector<32x8xf32>
    %8 = arith.maximumf %6, %7 : vector<32x8xf32>
    %c0_8 = arith.constant 0 : index
    %c0_9 = arith.constant 0 : index
    %9 = vector.load %arg5[%c0_8, %c0_9] : memref<16x32xf32, #tpu.memory_space<vmem>>, vector<16x32xf32>
    %cst_10 = arith.constant dense<0.000000e+00> : vector<16x8xf32>
    %10 = tpu.matmul %9, %8, %cst_10 {dimension_numbers = #tpu.dot_dimension_numbers<[1], [0], [0], [1], [0, 0, 1, 1], [], []>} : vector<16x32xf32>, vector<32x8xf32>, vector<16x8xf32> -> vector<16x8xf32>
    %c0_11 = arith.constant 0 : index
    %c0_12 = arith.constant 0 : index
    %11 = vector.load %arg6[%c0_11, %c0_12] : memref<16x1xf32, #tpu.memory_space<vmem>>, vector<16x1xf32>
    %12 = vector.broadcast %11 : vector<16x1xf32> to vector<16x8xf32>
    %13 = arith.addf %10, %12 : vector<16x8xf32>
    %cst_13 = arith.constant 0.000000e+00 : f32
    %14 = vector.broadcast %cst_13 : f32 to vector<16x8xf32>
    %15 = arith.maximumf %13, %14 : vector<16x8xf32>
    %c0_14 = arith.constant 0 : index
    %c0_15 = arith.constant 0 : index
    %16 = vector.load %arg7[%c0_14, %c0_15] : memref<2x16xf32, #tpu.memory_space<vmem>>, vector<2x16xf32>
    %cst_16 = arith.constant dense<0.000000e+00> : vector<2x8xf32>
    %17 = tpu.matmul %16, %15, %cst_16 {dimension_numbers = #tpu.dot_dimension_numbers<[1], [0], [0], [1], [0, 0, 1, 1], [], []>} : vector<2x16xf32>, vector<16x8xf32>, vector<2x8xf32> -> vector<2x8xf32>
    %c0_17 = arith.constant 0 : index
    %c0_18 = arith.constant 0 : index
    %18 = vector.load %arg8[%c0_17, %c0_18] : memref<2x1xf32, #tpu.memory_space<vmem>>, vector<2x1xf32>
    %19 = vector.broadcast %18 : vector<2x1xf32> to vector<2x8xf32>
    %20 = arith.addf %17, %19 : vector<2x8xf32>
    %21 = vector.extract_strided_slice %20 {offsets = [0, 0], sizes = [1, 8], strides = [1, 1]} : vector<2x8xf32> to vector<1x8xf32>
    %cst_19 = arith.constant 0.000000e+00 : f32
    %22 = vector.broadcast %cst_19 : f32 to vector<1x8xf32>
    %23 = arith.subf %22, %21 : vector<1x8xf32>
    %24 = vector.extract_strided_slice %20 {offsets = [1, 0], sizes = [1, 8], strides = [1, 1]} : vector<2x8xf32> to vector<1x8xf32>
    %25 = arith.subf %1, %24 : vector<1x8xf32>
    %26 = math.exp %23 : vector<1x8xf32>
    %27 = arith.mulf %25, %26 : vector<1x8xf32>
    %28 = tpu.concatenate %27, %23 in 0 : vector<1x8xf32>, vector<1x8xf32> -> vector<2x8xf32>
    %c0_20 = arith.constant 0 : index
    %c0_21 = arith.constant 0 : index
    %29 = vector.load %arg9[%c0_20, %c0_21] : memref<2x8xf32, #tpu.memory_space<vmem>>, vector<2x8xf32>
    tpu.vector_store %arg9[%c0_20, %c0_21], %28 {strides = array<i32>} : memref<2x8xf32, #tpu.memory_space<vmem>>, vector<2x8xf32>,
    return
  }
  func.func @transform_0(%arg0: i32) -> (i32, i32) {
    %c0_i32 = arith.constant 0 : i32
    %c0_i32_0 = arith.constant 0 : i32
    return %c0_i32, %arg0 : i32, i32
  }
  func.func @transform_1(%arg0: i32) -> (i32, i32) {
    %c0_i32 = arith.constant 0 : i32
    %c0_i32_0 = arith.constant 0 : i32
    return %c0_i32, %arg0 : i32, i32
  }
  func.func @transform_2(%arg0: i32) -> (i32, i32) {
    %c0_i32 = arith.constant 0 : i32
    %c0_i32_0 = arith.constant 0 : i32
    %c0_i32_1 = arith.constant 0 : i32
    return %c0_i32, %c0_i32_0 : i32, i32
  }
  func.func @transform_3(%arg0: i32) -> (i32, i32) {
    %c0_i32 = arith.constant 0 : i32
    %c0_i32_0 = arith.constant 0 : i32
    %c0_i32_1 = arith.constant 0 : i32
    return %c0_i32, %c0_i32_0 : i32, i32
  }
  func.func @transform_4(%arg0: i32) -> (i32, i32) {
    %c0_i32 = arith.constant 0 : i32
    %c0_i32_0 = arith.constant 0 : i32
    %c0_i32_1 = arith.constant 0 : i32
    return %c0_i32, %c0_i32_0 : i32, i32
  }
  func.func @transform_5(%arg0: i32) -> (i32, i32) {
    %c0_i32 = arith.constant 0 : i32
    %c0_i32_0 = arith.constant 0 : i32
    %c0_i32_1 = arith.constant 0 : i32
    return %c0_i32, %c0_i32_0 : i32, i32
  }
  func.func @transform_6(%arg0: i32) -> (i32, i32) {
    %c0_i32 = arith.constant 0 : i32
    %c0_i32_0 = arith.constant 0 : i32
    %c0_i32_1 = arith.constant 0 : i32
    return %c0_i32, %c0_i32_0 : i32, i32
  }
  func.func @transform_7(%arg0: i32) -> (i32, i32) {
    %c0_i32 = arith.constant 0 : i32
    %c0_i32_0 = arith.constant 0 : i32
    %c0_i32_1 = arith.constant 0 : i32
    return %c0_i32, %c0_i32_0 : i32, i32
  }
  func.func @transform_8(%arg0: i32) -> (i32, i32) {
    %c0_i32 = arith.constant 0 : i32
    %c0_i32_0 = arith.constant 0 : i32
    return %c0_i32, %arg0 : i32, i32
  }
}

</mosaic_0001>

<bundles_post_ra>
// kernel: tpu_custom_call.1
= control target key start
LH: loop header
LB: loop body
LE: loop exit
PB: predicated region body
PF: predicated region fallthrough
CT: control target
= control target key end

     0   :  { %vm73_vm0 = vcmask 1043456   ;;  %vm60_vm1 = vcmask 31744   ;;  %v467_v5 = vmov 0   ;;  %s574_s0 = inlined_call_operand.vmem [shape: f32[1,8], index: 0, kind: input, shape index: {}]   ;;  %s575_s1 = inlined_call_operand.vmem [shape: f32[4,8], index: 1, kind: input, shape index: {}]   ;;  %s576_s2 = inlined_call_operand.vmem [shape: f32[32,4], index: 2, kind: input, shape index: {}]   ;;  %s577_s3 = inlined_call_operand.vmem [shape: f32[32,1], index: 3, kind: input, shape index: {}]   ;;  %s578_s4 = inlined_call_operand.vmem [shape: f32[16,32], index: 4, kind: input, shape index: {}]   ;;  %s579_s5 = inlined_call_operand.vmem [shape: f32[16,1], index: 5, kind: input, shape index: {}]   ;;  %s580_s6 = inlined_call_operand.vmem [shape: f32[2,16], index: 6, kind: input, shape index: {}]   ;;  %s581_s7 = inlined_call_operand.vmem [shape: f32[2,1], index: 7, kind: input, shape index: {}]   ;;  %s582_s8 = inlined_call_operand.hbm [shape: f32[2,8], index: 8, kind: output, shape index: {}]  }
   0x1   :  { %v30_v0 = vld [vmem:[%s575_s1] sm:$0xf]  ;;  %v33_v2 = vld [vmem:[%s576_s2 + $0x8] sm:$0xff]  ;;  %v34_v3 = vld [vmem:[%s576_s2 + $0x10] sm:$0xff]  ;;  %441 = vset.pattern.permute.xlu0 %v467_v5  ;;  %442 = vset.pattern.permute.xlu1 %v467_v5 }
   0x2   :  { %v32_v1 = vld [vmem:[%s576_s2] sm:$0xff]  ;;  %410 = vmatprep.subr.msk.mxu0 %vm73_vm0, %v30_v0  ;;  %v39_v4 = vld [vmem:[%s577_s3 + $0x18] sm:$0xff]  ;;  %v37_v6 = vld [vmem:[%s577_s3 + $0x8] sm:$0xff] }
   0x3   :  { %412 = vmatprep.mubr.msk.f32.mxu0 %vm60_vm1, %v32_v1  ;;  %411 = vmatpush3.msk.msra.mxu0 %vm73_vm0, %v30_v0  ;;  %v35_v7 = vld [vmem:[%s576_s2 + $0x18] sm:$0xff]  ;;  %v38_v8 = vld [vmem:[%s577_s3 + $0x10] sm:$0xff] }
   0x4   :  { %413 = vmatmul.mubr.msk.f32.vlgmr.msra.gmra.mxu0 %vm60_vm1, %v33_v2  ;;  %57 = vperm.xlu0 %441, %v39_v4  }
   0x5   :  { %415 = vmatprep.mubr.msk.f32.mxu0 %vm60_vm1, %v34_v3 }
   0x6   :  { %13 = vsyncpa [#allocation3], 0  ;;  %47 = vperm.xlu1 %442, %v37_v6   ;;  %v36_v9 = vld [vmem:[%s577_s3] sm:$0xff]  ;;  %v169_v10 = vld [vmem:[%s579_s5 + $0x8] sm:$0xff]  ;;  %vm180_vm2 = vcmask 261120   ;;  %v468_v31 = vmov 0.0   ;;  %v350_v43 = vlaneseq }
   0x7   :  { %v168_v11 = vld [vmem:[%s579_s5] sm:$0xff]  ;;  %v167_v30 = vld [vmem:[%s578_s4 + $0x8] sm:$0xff]  ;;  %429 = vmatprep.subr.mxu0 %v468_v31  ;;  %vm469_vm3 = vmmov 0   ;;  %vm271_vm4 = vcmask 130048   ;;  %v470_v41 = vmov 1966171168  }
   0x8   :  { %416 = vmatmul.mubr.msk.f32.gmra.mxu0 %vm60_vm1, %v35_v7  ;;  %52 = vperm.xlu0 %441, %v38_v8   ;;  %v265_v12 = vld [vmem:[%s581_s7] sm:$0x3]  ;;  %v348_v42 = vunpack.c.l.s4 %v470_v41  ;;  %v351_v45 = vshrl.u32 %v350_v43, 7  ;;  %s471_s30 = smov [#allocation2]   ;;  %vm370_vm5 = vcmask 1040384   ;;  %vm372_vm6 = vcmask 58368  }
   0x9   :  { %v166_v13 = vld [vmem:[%s578_s4] sm:$0xff]  ;;  %433 = vmatprep.mubr.msk.f32.mxu0 %vm469_vm3, %v468_v31  ;;  %s380_s9 = sshll.u32 %s471_s30, 4  ;;  %s381_s9 = int_to_ptr.vmem [resolvable:$true] %s380_s9 }
   0xa   :  { %42 = vperm.xlu1 %442, %v36_v9   ;;  %426 = vmatprep.mubr.msk.f32.mxu1 %vm180_vm2, %v166_v13  ;;  %v264_v40 = vld [vmem:[%s580_s6] sm:$0x3]  ;;  %v349_v44 = vunpack.c.0.s8 %v348_v42  ;;  %s445_s10 = scalar_lea.vmem %s381_s9, 32  ;;  %p450_p1 = scmp.lt.s32.totalorder %s381_s9, %s381_s9 }
   0xb   :  { %v31_v56 = vld [vmem:[%s574_s0] sm:$0x1]  ;;  %p446_p0 = scmp.ne.s32.totalorder %s381_s9, %s445_s10  ;;  %p451_p2 = scmp.lt.s32.totalorder %s445_s10, %s445_s10 }
   0xc   :  { %177 = vperm.xlu0 %441, %v169_v10   ;;  %v352_v51 = vsub.s32 %v349_v44, %v351_v45 }
   0xd   :  { %p452_p3 = por %p451_p2, %p450_p1 }
   0xe   :  { %172 = vperm.xlu1 %442, %v168_v11  }
   0xf   :  { %p453_p4 = pnand %p452_p3, %p446_p0 }
  0x10   :  { %268 = vperm.xlu0 %441, %v265_v12  }
  0x7f   :  { %v58_v14 = vpop.permute.xlu0 %57 }
  0x81   :  { %v48_v15 = vpop.permute.xlu1 %47 }
  0x83   :  { %v53_v19 = vpop.permute.xlu0 %52 }
  0x85   :  { %v43_v21 = vpop.permute.xlu1 %42 }
  0x87   :  { %v178_v32 = vpop.permute.xlu0 %177 }
  0x89   :  { %v173_v35 = vpop.permute.xlu1 %172 }
  0x8b   :  { %v269_v46 = vpop.permute.xlu0 %268 }
  0xc4   :  { %v414_v16 = vpop.f32.mrf.mxu0 }
  0xc5   :  { %v149_v23 = vadd.f32 %v414_v16, %v48_v15 }
  0xc6   :  { %v143_v17 = vpop.f32.mrf.mxu0 }
  0xc7   :  { %v144_v26 = vadd.f32 %v143_v17, %v43_v21  ;;  %v163_v28 = vmax.f32 %v149_v23, 0.0 }
  0xc8   :  { %v417_v18 = vpop.f32.mrf.mxu0 }
  0xc9   :  { %v159_v20 = vadd.f32 %v417_v18, %v58_v14  ;;  %v162_v29 = vmax.f32 %v144_v26, 0.0 }
  0xca   :  { %v153_v22 = vpop.f32.mrf.mxu0 }
  0xcb   :  { %v165_v24 = vmax.f32 %v159_v20, 0.0  ;;  %v154_v25 = vadd.f32 %v153_v22, %v53_v19 }
  0xcd   :  { %v164_v27 = vmax.f32 %v154_v25, 0.0  ;;  %418 = vmatprep.subr.mxu1 %v165_v24 }
  0xce   :  { %419 = vmatpush3.msra.mxu1 %v165_v24 }
  0xcf   :  { %420 = vmatprep.subr.mxu1 %v164_v27 }
  0xd0   :  { %421 = vmatpush3.msra.mxu1 %v164_v27 }
  0xd1   :  { %422 = vmatprep.subr.mxu1 %v163_v28 }
  0xd2   :  { %423 = vmatpush3.msra.mxu1 %v163_v28 }
  0xd3   :  { %424 = vmatprep.subr.mxu1 %v162_v29 }
  0xd4   :  { %425 = vmatpush3.msra.mxu1 %v162_v29 }
  0xd5   :  { %427 = vmatmul.mubr.msk.f32.vlgmr.msra.gmra.mxu1 %vm180_vm2, %v167_v30 }
 0x195   :  { %v428_v33 = vpop.f32.mrf.mxu1 }
 0x196   :  { %v259_v34 = vadd.f32 %v428_v33, %v178_v32 }
 0x197   :  { %v253_v36 = vpop.f32.mrf.mxu1 }
 0x198   :  { %v263_v37 = vmax.f32 %v259_v34, 0.0  ;;  %v254_v38 = vadd.f32 %v253_v36, %v173_v35 }
 0x19a   :  { %v262_v39 = vmax.f32 %v254_v38, 0.0  ;;  %430 = vmatpush3.msra.mxu0 %v263_v37 }
 0x19b   :  { %431 = vmatprep.subr.mxu0 %v468_v31 }
 0x19c   :  { %432 = vmatpush3.msra.mxu0 %v262_v39 }
 0x19d   :  { %434 = vmatmul.mubr.msk.f32.vlgmr.msra.gmra.mxu0 %vm271_vm4, %v264_v40 }
 0x25d   :  { %v341_v47 = vpop.f32.mrf.mxu0 }
 0x25e   :  { %v342_v48 = vadd.f32 %v341_v47, %v269_v46 }
 0x25f   :  { %v435_v49 = vpop.f32.mrf.mxu0 }
 0x260   :  { %v345_v50 = vsub.f32 0.0, %v342_v48  ;;  %v353_v53 = vrot.slane %v342_v48, %v352_v51 }
 0x262   :  { %v364_v52 = vmul.f32 1.442695, %v345_v50  ;;  %v354_v54 = vcombine.high %v353_v53, %v353_v53  ;;  %v368_v59 = vrot.slane %v345_v50, 7 }
 0x264   :  { %443 = vpow2.f32 %v364_v52  ;;  %v361_v55 = vrot.slane %v354_v54, %v352_v51 }
 0x266   :  { %v363_v57 = vsub.f32 %v31_v56, %v361_v55 }
 0x271   :  { %v444_v58 = vpop.eup %443 }
 0x272   :  { %v366_v60 = vmul.f32 %v444_v58, %v363_v57 }
 0x274   :  { %v371_v61 = vsel %vm370_vm5, %v366_v60, %v368_v59 }
 0x275   :  { %373 = vst.msk [vmem:[#allocation2] sm:$0x3] %vm372_vm6, %v371_v61 }
 0x276   :  { %456 = shalt.err (!%p453_p4)
}
 0x277   :  { %383 = dma.vmem_to_hbm [thread:$0]  %s381_s9, 32, %s582_s8, [#allocation3]  }
 0x278   :  { %465 = dma.done.wait [#allocation3], 32  }
 0x279   :  { %466 = vsyncadd [#allocation3], 4294967264 }
 0x27a   :  { %387 = vsyncpa [#allocation3], 1 }

</bundles_post_ra>
